<compile_context>
chip_gen: v7x
topology: tpu7x:2x2x1
jax: 0.10.0
libtpu: 0.0.40
codegen_flags: <defaults>
</compile_context>

<pallas_src>
import jax
import jax.numpy as jnp
from jax.experimental import pallas as pl
from jax.experimental.pallas import tpu as pltpu

IN_FEATURES = 20
HID1 = 13
HID2 = 8
OUT_FEATURES = 3
LANE = 128           # lane-dense width used for all padded feature dims
MAX_TILE = 2048      # rows per grid step cap (keeps slabs tiny vs VMEM)


def mlp_kernel(x_ref, w1_ref, w2_ref, w3_ref, b3_ref, o_ref):
    # x: (Tb, 20); weights pre-transposed to (in, out) and lane-padded to 128.
    x = x_ref[...]
    h1 = jnp.dot(x, w1_ref[...], preferred_element_type=jnp.float32)   # (Tb, 128)
    h1 = jnp.maximum(h1, 0.0)                                          # ReLU
    h2 = jnp.dot(h1, w2_ref[...], preferred_element_type=jnp.float32)  # (Tb, 128)
    # sigmoid on padded lanes gives 0.5, but w3 rows >= HID2 are zero, so the
    # padded lanes never contaminate the real outputs.
    h2 = jax.nn.sigmoid(h2)
    z = jnp.dot(h2, w3_ref[...], preferred_element_type=jnp.float32)   # (Tb, 128)
    o_ref[...] = z + b3_ref[...]                                       # lane-dense store


def _round_up(v, m):
    return ((v + m - 1) // m) * m


@jax.jit
def mlp_forward(x, w1_p, w2_p, w3_p, b3_p):
    n, f = x.shape
    assert f == IN_FEATURES
    # Largest slab per step, but keep >=2 grid steps so a v7x chip can shard
    # the batch axis across both TensorCores; rows rounded to sublane (8).
    tile = min(_round_up(pl.cdiv(n, 2), 8), MAX_TILE)
    grid = (pl.cdiv(n, tile),)

    flops = 2 * n * (IN_FEATURES * HID1 + HID1 * HID2 + HID2 * OUT_FEATURES)
    bytes_accessed = 4 * (x.size + n * LANE
                          + w1_p.size + w2_p.size + w3_p.size + b3_p.size)

    out = pl.pallas_call(
        mlp_kernel,
        out_shape=jax.ShapeDtypeStruct((n, LANE), jnp.float32),
        grid_spec=pltpu.PrefetchScalarGridSpec(
            num_scalar_prefetch=0,
            grid=grid,
            in_specs=[
                pl.BlockSpec((tile, IN_FEATURES), lambda i: (i, 0)),   # x slab (ragged last)
                pl.BlockSpec((IN_FEATURES, LANE), lambda i: (0, 0)),   # w1^T padded
                pl.BlockSpec((LANE, LANE), lambda i: (0, 0)),          # w2^T padded
                pl.BlockSpec((LANE, LANE), lambda i: (0, 0)),          # w3^T padded
                pl.BlockSpec((1, LANE), lambda i: (0, 0)),             # bias padded
            ],
            out_specs=pl.BlockSpec((tile, LANE), lambda i: (i, 0)),
        ),
        compiler_params=pltpu.CompilerParams(
            dimension_semantics=("parallel",)),
        cost_estimate=pl.CostEstimate(
            flops=flops,
            transcendentals=n * HID2,
            bytes_accessed=bytes_accessed),
    )(x, w1_p, w2_p, w3_p, b3_p)
    return out[:, :OUT_FEATURES]


def init_params(key):
    # deterministic init mimicking nn.Linear's uniform(-1/sqrt(fan_in), 1/sqrt(fan_in))
    k1, k2, k3, k4 = jax.random.split(key, 4)

    def uni(k, shape, fan_in):
        bound = 1.0 / jnp.sqrt(fan_in)
        return jax.random.uniform(k, shape, jnp.float32, -bound, bound)

    # stored transposed: (in, out)
    w1_t = uni(k1, (IN_FEATURES, HID1), IN_FEATURES)
    w2_t = uni(k2, (HID1, HID2), HID1)
    w3_t = uni(k3, (HID2, OUT_FEATURES), HID2)
    b3 = uni(k4, (OUT_FEATURES,), HID2)
    return w1_t, w2_t, w3_t, b3


def pad_params(w1_t, w2_t, w3_t, b3):
    # Zero-pad all output (lane) dims to 128 so every matmul / store is lane-dense.
    w1_p = jnp.zeros((IN_FEATURES, LANE), jnp.float32).at[:, :HID1].set(w1_t)
    w2_p = jnp.zeros((LANE, LANE), jnp.float32).at[:HID1, :HID2].set(w2_t)
    w3_p = jnp.zeros((LANE, LANE), jnp.float32).at[:HID2, :OUT_FEATURES].set(w3_t)
    b3_p = jnp.zeros((1, LANE), jnp.float32).at[0, :OUT_FEATURES].set(b3)
    return w1_p, w2_p, w3_p, b3_p


if __name__ == "__main__":
    key = jax.random.PRNGKey(0)
    kx, kp = jax.random.split(key)
    # X = torch.rand((500, 20))  -> uniform [0, 1)
    x = jax.random.uniform(kx, (500, IN_FEATURES), jnp.float32)
    w1_t, w2_t, w3_t, b3 = init_params(kp)
    w1_p, w2_p, w3_p, b3_p = pad_params(w1_t, w2_t, w3_t, b3)

    zhat = mlp_forward(x, w1_p, w2_p, w3_p, b3_p)
    jax.block_until_ready(zhat)

    # pure-JAX reference check against the unpadded weights
    ref = jnp.maximum(x @ w1_t, 0.0)
    ref = jax.nn.sigmoid(ref @ w2_t)
    ref = ref @ w3_t + b3
    assert zhat.shape == (500, OUT_FEATURES)
    assert jnp.allclose(zhat, ref, atol=1e-5), "mismatch vs reference"

    print("KERNEL_OK")
</pallas_src>

<mosaic_0001>
module attributes {stable_mosaic.version = 11 : i64} {
  func.func @mlp_kernel(%arg0: i32, %arg1: memref<256x20xf32, #tpu.memory_space<vmem>>, %arg2: memref<20x128xf32, #tpu.memory_space<vmem>>, %arg3: memref<128x128xf32, #tpu.memory_space<vmem>>, %arg4: memref<128x128xf32, #tpu.memory_space<vmem>>, %arg5: memref<1x128xf32, #tpu.memory_space<vmem>>, %arg6: memref<256x128xf32, #tpu.memory_space<vmem>>) attributes {dimension_semantics = [#tpu.dimension_semantics<parallel>], iteration_bounds = array<i64: 2>, scalar_prefetch = 0 : i64, scratch_operands = 0 : i64, tpu.core_type = #tpu.core_type<tc>, window_params = [{transform_indices = @transform_0, window_bounds = array<i64: 256, 20>}, {pipeline_mode = #tpu.pipeline_mode<synchronous>, transform_indices = @transform_1, window_bounds = array<i64: 20, 128>}, {pipeline_mode = #tpu.pipeline_mode<synchronous>, transform_indices = @transform_2, window_bounds = array<i64: 128, 128>}, {pipeline_mode = #tpu.pipeline_mode<synchronous>, transform_indices = @transform_3, window_bounds = array<i64: 128, 128>}, {pipeline_mode = #tpu.pipeline_mode<synchronous>, transform_indices = @transform_4, window_bounds = array<i64: 1, 128>}, {transform_indices = @transform_5, window_bounds = array<i64: 256, 128>}]} {
    %c0 = arith.constant 0 : index
    %c0_0 = arith.constant 0 : index
    %0 = vector.load %arg1[%c0, %c0_0] : memref<256x20xf32, #tpu.memory_space<vmem>>, vector<256x20xf32>
    %c0_1 = arith.constant 0 : index
    %c0_2 = arith.constant 0 : index
    %1 = vector.load %arg2[%c0_1, %c0_2] : memref<20x128xf32, #tpu.memory_space<vmem>>, vector<20x128xf32>
    %cst = arith.constant dense<0.000000e+00> : vector<256x128xf32>
    %2 = tpu.matmul %0, %1, %cst {dimension_numbers = #tpu.dot_dimension_numbers<[1], [0], [0], [1], [0, 0, 1, 1], [], []>} : vector<256x20xf32>, vector<20x128xf32>, vector<256x128xf32> -> vector<256x128xf32>
    %cst_3 = arith.constant 0.000000e+00 : f32
    %3 = vector.broadcast %cst_3 : f32 to vector<256x128xf32>
    %4 = arith.maximumf %2, %3 : vector<256x128xf32>
    %c0_4 = arith.constant 0 : index
    %c0_5 = arith.constant 0 : index
    %5 = vector.load %arg3[%c0_4, %c0_5] : memref<128x128xf32, #tpu.memory_space<vmem>>, vector<128x128xf32>
    %cst_6 = arith.constant dense<0.000000e+00> : vector<256x128xf32>
    %6 = tpu.matmul %4, %5, %cst_6 {dimension_numbers = #tpu.dot_dimension_numbers<[1], [0], [0], [1], [0, 0, 1, 1], [], []>} : vector<256x128xf32>, vector<128x128xf32>, vector<256x128xf32> -> vector<256x128xf32>
    %7 = arith.negf %6 : vector<256x128xf32>
    %8 = math.exp %7 : vector<256x128xf32>
    %cst_7 = arith.constant 1.000000e+00 : f32
    %9 = vector.broadcast %cst_7 : f32 to vector<256x128xf32>
    %10 = arith.addf %9, %8 : vector<256x128xf32>
    %11 = arith.divf %9, %10 : vector<256x128xf32>
    %c0_8 = arith.constant 0 : index
    %c0_9 = arith.constant 0 : index
    %12 = vector.load %arg4[%c0_8, %c0_9] : memref<128x128xf32, #tpu.memory_space<vmem>>, vector<128x128xf32>
    %cst_10 = arith.constant dense<0.000000e+00> : vector<256x128xf32>
    %13 = tpu.matmul %11, %12, %cst_10 {dimension_numbers = #tpu.dot_dimension_numbers<[1], [0], [0], [1], [0, 0, 1, 1], [], []>} : vector<256x128xf32>, vector<128x128xf32>, vector<256x128xf32> -> vector<256x128xf32>
    %c0_11 = arith.constant 0 : index
    %c0_12 = arith.constant 0 : index
    %14 = vector.load %arg5[%c0_11, %c0_12] : memref<1x128xf32, #tpu.memory_space<vmem>>, vector<1x128xf32>
    %15 = vector.broadcast %14 : vector<1x128xf32> to vector<256x128xf32>
    %16 = arith.addf %13, %15 : vector<256x128xf32>
    %c0_13 = arith.constant 0 : index
    %c0_14 = arith.constant 0 : index
    %17 = vector.load %arg6[%c0_13, %c0_14] : memref<256x128xf32, #tpu.memory_space<vmem>>, vector<256x128xf32>
    tpu.vector_store %arg6[%c0_13, %c0_14], %16 {strides = array<i32>} : memref<256x128xf32, #tpu.memory_space<vmem>>, vector<256x128xf32>,
    return
  }
  func.func @transform_0(%arg0: i32) -> (i32, i32) {
    %c0_i32 = arith.constant 0 : i32
    %c0_i32_0 = arith.constant 0 : i32
    return %arg0, %c0_i32 : i32, i32
  }
  func.func @transform_1(%arg0: i32) -> (i32, i32) {
    %c0_i32 = arith.constant 0 : i32
    %c0_i32_0 = arith.constant 0 : i32
    %c0_i32_1 = arith.constant 0 : i32
    return %c0_i32, %c0_i32_0 : i32, i32
  }
  func.func @transform_2(%arg0: i32) -> (i32, i32) {
    %c0_i32 = arith.constant 0 : i32
    %c0_i32_0 = arith.constant 0 : i32
    %c0_i32_1 = arith.constant 0 : i32
    return %c0_i32, %c0_i32_0 : i32, i32
  }
  func.func @transform_3(%arg0: i32) -> (i32, i32) {
    %c0_i32 = arith.constant 0 : i32
    %c0_i32_0 = arith.constant 0 : i32
    %c0_i32_1 = arith.constant 0 : i32
    return %c0_i32, %c0_i32_0 : i32, i32
  }
  func.func @transform_4(%arg0: i32) -> (i32, i32) {
    %c0_i32 = arith.constant 0 : i32
    %c0_i32_0 = arith.constant 0 : i32
    %c0_i32_1 = arith.constant 0 : i32
    return %c0_i32, %c0_i32_0 : i32, i32
  }
  func.func @transform_5(%arg0: i32) -> (i32, i32) {
    %c0_i32 = arith.constant 0 : i32
    %c0_i32_0 = arith.constant 0 : i32
    return %arg0, %c0_i32 : i32, i32
  }
}

</mosaic_0001>

<bundles_post_ra>
// kernel: mlp_forward.1
= control target key start
LH: loop header
LB: loop body
LE: loop exit
PB: predicated region body
PF: predicated region fallthrough
CT: control target
= control target key end

     0   :  { %s2535_s18 = smov 0   ;;  %s2537_s19 = smov 0   ;;  %s2958_s0 = inlined_call_operand.vmem [shape: f32[500,20], index: 0, kind: input, shape index: {}]   ;;  %s2959_s1 = inlined_call_operand.vmem [shape: f32[20,128], index: 1, kind: input, shape index: {}]   ;;  %s2960_s2 = inlined_call_operand.vmem [shape: f32[128,128], index: 2, kind: input, shape index: {}]   ;;  %s2961_s3 = inlined_call_operand.vmem [shape: f32[128,128], index: 3, kind: input, shape index: {}]   ;;  %s2962_s4 = inlined_call_operand.vmem [shape: f32[1,128], index: 4, kind: input, shape index: {}]   ;;  %s2963_s5 = inlined_call_operand.vmem [shape: f32[500,128], index: 5, kind: output, shape index: {}]  }
   0x1   :  { %s2539_s20 = smov 0  }
   0x2 LB: > { %s2548_s21 = sadd.s32 4294967295, %s2471_s20   ;;  %s2550_s22 = sadd.s32 1, %s2471_s20   ;;  %s2471_s20 = sphi %s2539_s20, %s2972_s20   ;;  %s2467_s19 = sphi %s2537_s19, %s2971_s19   ;;  %s2463_s18 = sphi %s2535_s18, %s2970_s18  }
   0x3   : > { %s129_s23 = ssub.s32 %s2471_s20, %s2550_s22  ;;  %s132_s24 = sadd.s32 1, %s2467_s19 }
   0x4   : > { %p130_p0 = scmp.eq.s32.totalorder %s129_s23, 0  ;;  %p142_p1 = scmp.ne.s32.totalorder %s2467_s19, %s2463_s18 }
   0x5   : > { %p143_p2 = scmp.eq.s32.totalorder %s2548_s21, 1  ;;  %p1694_p3 = scmp.ge.s32.totalorder %s2471_s20, 1 }
   0x6   : > { %s2558_s25 = scalar_select %p130_p0, %s2467_s19, %s132_s24  }
   0x7   : > { %p2560_p4 = por %p143_p2, %p142_p1  ;;  %p196_p5 = scmp.lt.s32.totalorder %s2471_s20, 3 }
   0x9   : > { %p197_p6 = pnand %p1694_p3, %p196_p5 }
   0xa   : > { %v278_v0 = vld [vmem:[%s2959_s1] sm:$0xff] (!%p197_p6)  ;;  %v279_v1 = vld [vmem:[%s2959_s1 + $0x8] sm:$0xff] (!%p197_p6)  ;;  %s2571_s6 = sshll.u32 (!%p197_p6), %s2548_s21, 5  ;;  %v280_v3 = vld [vmem:[%s2959_s1 + $0x10] sm:$0xf] (!%p197_p6)  ;;  %vm378_vm0 = vcmask (!%p197_p6), 1043456  }
   0xb   : > { %200 = sbr.rel (%p197_p6) target bundleno = 815 (0x32f), region = 40  ;;  %v2129_v2 = vpack.c.bf16 (!%p197_p6), %v279_v1, %v278_v0  ;;  %p232_p7 = scmp.lt.s32.totalorder (!%p197_p6), %s2571_s6, 62  ;;  %v639_v4 = vld [vmem:[%s2960_s2] sm:$0xff] (!%p197_p6)  ;;  %v640_v5 = vld [vmem:[%s2960_s2 + $0x8] sm:$0xff] (!%p197_p6)  ;;  %vm281_vm1 = vcmask (!%p197_p6), 162816   ;;  %v641_v10 = vld [vmem:[%s2960_s2 + $0x10] sm:$0xff] (!%p197_p6) }
   0xc   : > { %v2133_v6 = vpack.c.bf16 (!%p197_p6), %v640_v5, %v639_v4  ;;  %v642_v11 = vld [vmem:[%s2960_s2 + $0x18] sm:$0xff] (!%p197_p6)  ;;  %v643_v18 = vld [vmem:[%s2960_s2 + $0x20] sm:$0xff] (!%p197_p6)  ;;  %v644_v19 = vld [vmem:[%s2960_s2 + $0x28] sm:$0xff] (!%p197_p6)  ;;  %s224_s7 = sand.u32 (!%p197_p6), 1, %s2463_s18  }
   0xd   : > { %2130 = vmatprep.subr.bf16.mxu0 (!%p197_p6), %v2129_v2  ;;  %2197 = vmatprep.subr.bf16.mxu1 (!%p197_p6), %v2129_v2  ;;  %v2137_v16 = vpack.c.bf16 (!%p197_p6), %v642_v11, %v641_v10  ;;  %v2141_v24 = vpack.c.bf16 (!%p197_p6), %v644_v19, %v643_v18  ;;  %v645_v25 = vld [vmem:[%s2960_s2 + $0x30] sm:$0xff] (!%p197_p6)  ;;  %v646_v26 = vld [vmem:[%s2960_s2 + $0x38] sm:$0xff] (!%p197_p6)  ;;  %v647_v32 = vld [vmem:[%s2960_s2 + $0x40] sm:$0xff] (!%p197_p6)  ;;  %s1695_s8 = sshll.u32 (!%p197_p6), %s224_s7, 8 }
   0xe   : > { %2132 = vmatpush3.bf16.msra.mxu0 (!%p197_p6), %v2129_v2  ;;  %2199 = vmatpush3.bf16.msra.mxu1 (!%p197_p6), %v2129_v2  ;;  %v2145_v31 = vpack.c.bf16 (!%p197_p6), %v646_v26, %v645_v25  ;;  %v648_v33 = vld [vmem:[%s2960_s2 + $0x48] sm:$0xff] (!%p197_p6)  ;;  %v649_v39 = vld [vmem:[%s2960_s2 + $0x50] sm:$0xff] (!%p197_p6)  ;;  %v650_v40 = vld [vmem:[%s2960_s2 + $0x58] sm:$0xff] (!%p197_p6)  ;;  %s2755_s11 = scalar_lea.vmem (!%p197_p6), [#allocation2], %s1695_s8  }
   0xf   : > { %1919 = vmatprep.subr.msk.mxu0 (!%p197_p6), %vm378_vm0, %v280_v3  ;;  %2198 = vmatprep.subr.msk.mxu1 (!%p197_p6), %vm378_vm0, %v280_v3  ;;  %v2149_v38 = vpack.c.bf16 (!%p197_p6), %v648_v33, %v647_v32  ;;  %v2153_v45 = vpack.c.bf16 (!%p197_p6), %v650_v40, %v649_v39  ;;  %v651_v46 = vld [vmem:[%s2960_s2 + $0x60] sm:$0xff] (!%p197_p6)  ;;  %v652_v47 = vld [vmem:[%s2960_s2 + $0x68] sm:$0xff] (!%p197_p6)  ;;  %v653_v57 = vld [vmem:[%s2960_s2 + $0x70] sm:$0xff] (!%p197_p6) }
  0x10   : > { %v2157_v52 = vpack.c.bf16 (!%p197_p6), %v652_v47, %v651_v46  ;;  %v654_v58 = vld [vmem:[%s2960_s2 + $0x78] sm:$0xff] (!%p197_p6)  ;;  %v1072_v60 = vld [vmem:[%s2961_s3] sm:$0xff] (!%p197_p6)  ;;  %v1073_v61 = vld [vmem:[%s2961_s3 + $0x8] sm:$0xff] (!%p197_p6) }
  0x11   : > { %v2161_v59 = vpack.c.bf16 (!%p197_p6), %v654_v58, %v653_v57  ;;  %v2165_v62 = vpack.c.bf16 (!%p197_p6), %v1073_v61, %v1072_v60 }
  0x12   : > { %s233_s9 = scalar_select %p232_p7, %s2571_s6, 62  ;;  %1920 = vmatpush3.msk.msra.mxu0 %vm378_vm0, %v280_v3  ;;  %2200 = vmatpush3.msk.msra.mxu1 %vm378_vm0, %v280_v3 }
  0x13   : > { %2134 = vmatprep.subr.bf16.mxu1 %v2133_v6  ;;  %2166 = vmatprep.subr.bf16.mxu0 %v2165_v62  ;;  %s1360_s18 = ssub.s32 (%p2560_p4), 63, %s2571_s6  ;;  %s1781_s12 = sshll.u32 (%p2560_p4), %s2548_s21, 8 }
  0x14   : > { %s1697_s14 = sshll.u32 %s233_s9, 3  ;;  %p1361_p8 = scmp.lt.s32.totalorder (%p2560_p4), %s1360_s18, 32 }
  0x15   : > { %s2589_s17 = scalar_lea.vmem %s2958_s0, %s1697_s14  ;;  %s2826_s14 = scalar_lea.vmem (%p2560_p4), %s2963_s5, %s1781_s12  }
  0x16   : > { %v246_v7 = vld [vmem:[%s2589_s17] sm:$0xff]  ;;  %v247_v8 = vld [vmem:[%s2589_s17 + $0x8] sm:$0xff]  ;;  %v248_v9 = vld [vmem:[%s2589_s17 + $0x10] sm:$0xff] }
  0x17   : > { %1921 = vmatprep.mubr.msk.f32.mxu0 %vm281_vm1, %v246_v7  ;;  %v249_v12 = vld [vmem:[%s2589_s17 + $0x18] sm:$0xff]  ;;  %v250_v13 = vld [vmem:[%s2589_s17 + $0x20] sm:$0xff]  ;;  %v263_v15 = vld [vmem:[%s2589_s17 + $0x88] sm:$0xff] }
  0x18   : > { %1922 = vmatmul.mubr.msk.f32.vlgmr.msra.gmra.mrb[0].mxu0 %vm281_vm1, %v247_v8  ;;  %v262_v14 = vld [vmem:[%s2589_s17 + $0x80] sm:$0xff]  ;;  %v264_v17 = vld [vmem:[%s2589_s17 + $0x90] sm:$0xff]  ;;  %v251_v20 = vld [vmem:[%s2589_s17 + $0x28] sm:$0xff] }
  0x19   : > { %1924 = vmatprep.mubr.msk.f32.mxu0 %vm281_vm1, %v248_v9  ;;  %1945 = vmatprep.mubr.msk.f32.mxu1 %vm281_vm1, %v262_v14  ;;  %v252_v21 = vld [vmem:[%s2589_s17 + $0x30] sm:$0xff]  ;;  %v265_v22 = vld [vmem:[%s2589_s17 + $0x98] sm:$0xff]  ;;  %v266_v23 = vld [vmem:[%s2589_s17 + $0xa0] sm:$0xff] }
  0x1a   : > { %1946 = vmatmul.mubr.msk.f32.vlgmr.msra.gmra.mrb[0].mxu1 %vm281_vm1, %v263_v15  ;;  %v253_v27 = vld [vmem:[%s2589_s17 + $0x38] sm:$0xff]  ;;  %v254_v28 = vld [vmem:[%s2589_s17 + $0x40] sm:$0xff]  ;;  %v267_v29 = vld [vmem:[%s2589_s17 + $0xa8] sm:$0xff]  ;;  %2168 = vmatpush3.bf16.msra.mxu0 %v2165_v62 }
  0x1b   : > { %1948 = vmatprep.mubr.msk.f32.mxu1 %vm281_vm1, %v264_v17  ;;  %2136 = vmatpush3.bf16.msra.mxu1 %v2133_v6  ;;  %v268_v30 = vld [vmem:[%s2589_s17 + $0xb0] sm:$0xff]  ;;  %v255_v34 = vld [vmem:[%s2589_s17 + $0x48] sm:$0xff]  ;;  %v269_v36 = vld [vmem:[%s2589_s17 + $0xb8] sm:$0xff] }
  0x1c   : > { %1925 = vmatmul.mubr.msk.f32.gmra.mrb[2].mxu0 %vm281_vm1, %v249_v12  ;;  %2138 = vmatprep.subr.bf16.mxu1 %v2137_v16  ;;  %v256_v35 = vld [vmem:[%s2589_s17 + $0x50] sm:$0xff]  ;;  %v270_v37 = vld [vmem:[%s2589_s17 + $0xc0] sm:$0xff]  ;;  %v257_v41 = vld [vmem:[%s2589_s17 + $0x58] sm:$0xff] }
  0x1d   : > { %1927 = vmatprep.mubr.msk.f32.mxu0 %vm281_vm1, %v250_v13  ;;  %v258_v42 = vld [vmem:[%s2589_s17 + $0x60] sm:$0xff]  ;;  %v271_v43 = vld [vmem:[%s2589_s17 + $0xc8] sm:$0xff]  ;;  %v272_v44 = vld [vmem:[%s2589_s17 + $0xd0] sm:$0xff] }
  0x1e   : > { %1949 = vmatmul.mubr.msk.f32.gmra.mrb[2].mxu1 %vm281_vm1, %v265_v22  ;;  %v259_v48 = vld [vmem:[%s2589_s17 + $0x68] sm:$0xff]  ;;  %v260_v49 = vld [vmem:[%s2589_s17 + $0x70] sm:$0xff]  ;;  %v273_v50 = vld [vmem:[%s2589_s17 + $0xd8] sm:$0xff] }
  0x1f   : > { %1951 = vmatprep.mubr.msk.f32.mxu1 %vm281_vm1, %v266_v23  ;;  %2140 = vmatpush3.bf16.msra.mxu1 %v2137_v16  ;;  %v274_v51 = vld [vmem:[%s2589_s17 + $0xe0] sm:$0xff]  ;;  %v261_v53 = vld [vmem:[%s2589_s17 + $0x78] sm:$0xff]  ;;  %v275_v54 = vld [vmem:[%s2589_s17 + $0xe8] sm:$0xff] }
  0x20   : > { %1928 = vmatmul.mubr.msk.f32.gmra.mrb[4].mxu0 %vm281_vm1, %v251_v20  ;;  %2142 = vmatprep.subr.bf16.mxu1 %v2141_v24  ;;  %v276_v55 = vld [vmem:[%s2589_s17 + $0xf0] sm:$0xff]  ;;  %v277_v56 = vld [vmem:[%s2589_s17 + $0xf8] sm:$0xff] }
  0x21   : > { %1930 = vmatprep.mubr.msk.f32.mxu0 %vm281_vm1, %v252_v21 }
  0x22   : > { %1952 = vmatmul.mubr.msk.f32.gmra.mrb[4].mxu1 %vm281_vm1, %v267_v29 }
  0x23   : > { %1954 = vmatprep.mubr.msk.f32.mxu1 %vm281_vm1, %v268_v30  ;;  %2144 = vmatpush3.bf16.msra.mxu1 %v2141_v24 }
  0x24   : > { %1931 = vmatmul.mubr.msk.f32.gmra.mrb[6].mxu0 %vm281_vm1, %v253_v27  ;;  %2146 = vmatprep.subr.bf16.mxu1 %v2145_v31 }
  0x25   : > { %1933 = vmatprep.mubr.msk.f32.mxu0 %vm281_vm1, %v254_v28 }
  0x26   : > { %1955 = vmatmul.mubr.msk.f32.gmra.mrb[6].mxu1 %vm281_vm1, %v269_v36 }
  0x27   : > { %1957 = vmatprep.mubr.msk.f32.mxu1 %vm281_vm1, %v270_v37  ;;  %2148 = vmatpush3.bf16.msra.mxu1 %v2145_v31 }
  0x28   : > { %1934 = vmatmul.mubr.msk.f32.gmra.mrb[8].mxu0 %vm281_vm1, %v255_v34  ;;  %2150 = vmatprep.subr.bf16.mxu1 %v2149_v38 }
  0x29   : > { %1936 = vmatprep.mubr.msk.f32.mxu0 %vm281_vm1, %v256_v35 }
  0x2a   : > { %1958 = vmatmul.mubr.msk.f32.gmra.mrb[8].mxu1 %vm281_vm1, %v271_v43 }
  0x2b   : > { %1960 = vmatprep.mubr.msk.f32.mxu1 %vm281_vm1, %v272_v44  ;;  %2152 = vmatpush3.bf16.msra.mxu1 %v2149_v38 }
  0x2c   : > { %1937 = vmatmul.mubr.msk.f32.gmra.mrb[10].mxu0 %vm281_vm1, %v257_v41  ;;  %2154 = vmatprep.subr.bf16.mxu1 %v2153_v45 }
  0x2d   : > { %1939 = vmatprep.mubr.msk.f32.mxu0 %vm281_vm1, %v258_v42 }
  0x2e   : > { %1961 = vmatmul.mubr.msk.f32.gmra.mrb[10].mxu1 %vm281_vm1, %v273_v50 }
  0x2f   : > { %1963 = vmatprep.mubr.msk.f32.mxu1 %vm281_vm1, %v274_v51  ;;  %2156 = vmatpush3.bf16.msra.mxu1 %v2153_v45 }
  0x30   : > { %1940 = vmatmul.mubr.msk.f32.gmra.mrb[12].mxu0 %vm281_vm1, %v259_v48  ;;  %2158 = vmatprep.subr.bf16.mxu1 %v2157_v52 }
  0x31   : > { %1942 = vmatprep.mubr.msk.f32.mxu0 %vm281_vm1, %v260_v49 }
  0x32   : > { %1964 = vmatmul.mubr.msk.f32.gmra.mrb[12].mxu1 %vm281_vm1, %v275_v54 }
  0x33   : > { %1966 = vmatprep.mubr.msk.f32.mxu1 %vm281_vm1, %v276_v55  ;;  %2160 = vmatpush3.bf16.msra.mxu1 %v2157_v52 }
  0x34   : > { %1943 = vmatmul.mubr.msk.f32.gmra.mrb[14].mxu0 %vm281_vm1, %v261_v53  ;;  %2162 = vmatprep.subr.bf16.mxu1 %v2161_v59 }
  0x36   : > { %1967 = vmatmul.mubr.msk.f32.gmra.mrb[14].mxu1 %vm281_vm1, %v277_v56 }
  0x37   : > { %2164 = vmatpush3.bf16.msra.mxu1 %v2161_v59 }
  0xeb   : > { %v1923_v63 = vpop.f32.mrb[0].mxu0 }
  0xec   : > { %v448_v0 = vpop.f32.mrb[1].mxu0  ;;  %v608_v2 = vmax.f32 %v1923_v63, 0.0  ;;  %v1074_v63 = vld [vmem:[%s2961_s3 + $0x10] sm:$0xff] }
  0xed   : > { %v607_v1 = vmax.f32 %v448_v0, 0.0  ;;  %v1947_v5 = vpop.f32.mrb[0].mxu1  ;;  %v1075_v0 = vld [vmem:[%s2961_s3 + $0x18] sm:$0xff] }
  0xee   : > { %v528_v7 = vpop.f32.mrb[1].mxu1  ;;  %v624_v49 = vmax.f32 %v1947_v5, 0.0  ;;  %v1078_v5 = vld [vmem:[%s2961_s3 + $0x30] sm:$0xff] }
  0xef   : > { %v1926_v3 = vpop.f32.mrb[2].mxu0  ;;  %2001 = vmatprep.mubr.f32.mxu1 %v607_v1  ;;  %v623_v43 = vmax.f32 %v528_v7, 0.0  ;;  %v2169_v1 = vpack.c.bf16 %v1075_v0, %v1074_v63 }
  0xf0   : > { %v458_v4 = vpop.f32.mrb[3].mxu0  ;;  %2002 = vmatmul.mubr.f32.vlgmr.msra.gmra.mrb[16].mxu1 %v608_v2  ;;  %v610_v8 = vmax.f32 %v1926_v3, 0.0  ;;  %v1076_v2 = vld [vmem:[%s2961_s3 + $0x20] sm:$0xff]  ;;  %v1077_v3 = vld [vmem:[%s2961_s3 + $0x28] sm:$0xff] }
  0xf1   : > { %v609_v6 = vmax.f32 %v458_v4, 0.0  ;;  %v1950_v11 = vpop.f32.mrb[2].mxu1  ;;  %2170 = vmatprep.subr.bf16.mxu0 %v2169_v1  ;;  %v2173_v4 = vpack.c.bf16 %v1077_v3, %v1076_v2 }
  0xf2   : > { %v538_v13 = vpop.f32.mrb[3].mxu1  ;;  %v626_v51 = vmax.f32 %v1950_v11, 0.0  ;;  %2172 = vmatpush3.bf16.msra.mxu0 %v2169_v1  ;;  %v1082_v11 = vld [vmem:[%s2961_s3 + $0x50] sm:$0xff] }
  0xf3   : > { %v1929_v9 = vpop.f32.mrb[4].mxu0  ;;  %2004 = vmatprep.mubr.f32.mxu1 %v609_v6  ;;  %v625_v47 = vmax.f32 %v538_v13, 0.0  ;;  %2174 = vmatprep.subr.bf16.mxu0 %v2173_v4  ;;  %v1079_v6 = vld [vmem:[%s2961_s3 + $0x38] sm:$0xff] }
  0xf4   : > { %v468_v10 = vpop.f32.mrb[5].mxu0  ;;  %2005 = vmatmul.mubr.f32.gmra.mrb[18].mxu1 %v610_v8  ;;  %v612_v14 = vmax.f32 %v1929_v9, 0.0  ;;  %v2177_v7 = vpack.c.bf16 %v1079_v6, %v1078_v5  ;;  %v1080_v8 = vld [vmem:[%s2961_s3 + $0x40] sm:$0xff]  ;;  %v1081_v9 = vld [vmem:[%s2961_s3 + $0x48] sm:$0xff] }
  0xf5   : > { %v611_v12 = vmax.f32 %v468_v10, 0.0  ;;  %v1953_v17 = vpop.f32.mrb[4].mxu1  ;;  %v2181_v10 = vpack.c.bf16 %v1081_v9, %v1080_v8 }
  0xf6   : > { %v548_v19 = vpop.f32.mrb[5].mxu1  ;;  %v628_v53 = vmax.f32 %v1953_v17, 0.0  ;;  %2176 = vmatpush3.bf16.msra.mxu0 %v2173_v4  ;;  %v1086_v17 = vld [vmem:[%s2961_s3 + $0x70] sm:$0xff] }
  0xf7   : > { %v1932_v15 = vpop.f32.mrb[6].mxu0  ;;  %2007 = vmatprep.mubr.f32.mxu1 %v611_v12  ;;  %v627_v50 = vmax.f32 %v548_v19, 0.0  ;;  %2178 = vmatprep.subr.bf16.mxu0 %v2177_v7  ;;  %v1083_v12 = vld [vmem:[%s2961_s3 + $0x58] sm:$0xff] }
  0xf8   : > { %v478_v16 = vpop.f32.mrb[7].mxu0  ;;  %2008 = vmatmul.mubr.f32.gmra.mrb[20].mxu1 %v612_v14  ;;  %v614_v20 = vmax.f32 %v1932_v15, 0.0  ;;  %v2185_v13 = vpack.c.bf16 %v1083_v12, %v1082_v11  ;;  %v1084_v14 = vld [vmem:[%s2961_s3 + $0x60] sm:$0xff]  ;;  %v1085_v15 = vld [vmem:[%s2961_s3 + $0x68] sm:$0xff] }
  0xf9   : > { %v613_v18 = vmax.f32 %v478_v16, 0.0  ;;  %v1956_v23 = vpop.f32.mrb[6].mxu1  ;;  %v2189_v16 = vpack.c.bf16 %v1085_v15, %v1084_v14 }
  0xfa   : > { %v558_v25 = vpop.f32.mrb[7].mxu1  ;;  %v630_v55 = vmax.f32 %v1956_v23, 0.0  ;;  %2180 = vmatpush3.bf16.msra.mxu0 %v2177_v7 }
  0xfb   : > { %v1935_v21 = vpop.f32.mrb[8].mxu0  ;;  %2010 = vmatprep.mubr.f32.mxu1 %v613_v18  ;;  %v629_v52 = vmax.f32 %v558_v25, 0.0  ;;  %2182 = vmatprep.subr.bf16.mxu0 %v2181_v10  ;;  %v1087_v18 = vld [vmem:[%s2961_s3 + $0x78] sm:$0xff] }
  0xfc   : > { %v488_v22 = vpop.f32.mrb[9].mxu0  ;;  %2011 = vmatmul.mubr.f32.gmra.mrb[22].mxu1 %v614_v20  ;;  %v616_v26 = vmax.f32 %v1935_v21, 0.0  ;;  %v2193_v19 = vpack.c.bf16 %v1087_v18, %v1086_v17 }
  0xfd   : > { %v615_v24 = vmax.f32 %v488_v22, 0.0  ;;  %v1959_v29 = vpop.f32.mrb[8].mxu1 }
  0xfe   : > { %v568_v31 = vpop.f32.mrb[9].mxu1  ;;  %v632_v57 = vmax.f32 %v1959_v29, 0.0  ;;  %2184 = vmatpush3.bf16.msra.mxu0 %v2181_v10 }
  0xff   : > { %v1938_v27 = vpop.f32.mrb[10].mxu0  ;;  %2013 = vmatprep.mubr.f32.mxu1 %v615_v24  ;;  %v631_v54 = vmax.f32 %v568_v31, 0.0  ;;  %2186 = vmatprep.subr.bf16.mxu0 %v2185_v13 }
 0x100   : > { %v498_v28 = vpop.f32.mrb[11].mxu0  ;;  %2014 = vmatmul.mubr.f32.gmra.mrb[24].mxu1 %v616_v26  ;;  %v618_v32 = vmax.f32 %v1938_v27, 0.0 }
 0x101   : > { %v617_v30 = vmax.f32 %v498_v28, 0.0  ;;  %v1962_v35 = vpop.f32.mrb[10].mxu1 }
 0x102   : > { %v578_v37 = vpop.f32.mrb[11].mxu1  ;;  %v634_v59 = vmax.f32 %v1962_v35, 0.0  ;;  %2188 = vmatpush3.bf16.msra.mxu0 %v2185_v13 }
 0x103   : > { %v1941_v33 = vpop.f32.mrb[12].mxu0  ;;  %2016 = vmatprep.mubr.f32.mxu1 %v617_v30  ;;  %v633_v56 = vmax.f32 %v578_v37, 0.0  ;;  %2190 = vmatprep.subr.bf16.mxu0 %v2189_v16 }
 0x104   : > { %v508_v34 = vpop.f32.mrb[13].mxu0  ;;  %2017 = vmatmul.mubr.f32.gmra.mrb[26].mxu1 %v618_v32  ;;  %v620_v38 = vmax.f32 %v1941_v33, 0.0 }
 0x105   : > { %v619_v36 = vmax.f32 %v508_v34, 0.0  ;;  %v1965_v41 = vpop.f32.mrb[12].mxu1 }
 0x106   : > { %v588_v44 = vpop.f32.mrb[13].mxu1  ;;  %v636_v61 = vmax.f32 %v1965_v41, 0.0  ;;  %2192 = vmatpush3.bf16.msra.mxu0 %v2189_v16 }
 0x107   : > { %v1944_v39 = vpop.f32.mrb[14].mxu0  ;;  %2019 = vmatprep.mubr.f32.mxu1 %v619_v36  ;;  %v635_v58 = vmax.f32 %v588_v44, 0.0  ;;  %2194 = vmatprep.subr.bf16.mxu0 %v2193_v19 }
 0x108   : > { %v518_v40 = vpop.f32.mrb[15].mxu0  ;;  %2020 = vmatmul.mubr.f32.gmra.mrb[28].mxu1 %v620_v38  ;;  %v622_v45 = vmax.f32 %v1944_v39, 0.0 }
 0x109   : > { %v621_v42 = vmax.f32 %v518_v40, 0.0  ;;  %v1968_v46 = vpop.f32.mrb[14].mxu1 }
 0x10a   : > { %v598_v48 = vpop.f32.mrb[15].mxu1  ;;  %v638_v62 = vmax.f32 %v1968_v46, 0.0  ;;  %2196 = vmatpush3.bf16.msra.mxu0 %v2193_v19 }
 0x10b   : > { %2022 = vmatprep.mubr.f32.mxu1 %v621_v42  ;;  %v637_v60 = vmax.f32 %v598_v48, 0.0 }
 0x10c   : > { %2023 = vmatmul.mubr.f32.gmra.mrb[30].mxu1 %v622_v45 }
 0x10d   : > { %2025 = vmatprep.mubr.f32.mxu1 %v623_v43 }
 0x110   : > { %2026 = vmatmul.mubr.f32.gmra.mrb[32].mxu1 %v624_v49 }
 0x111   : > { %2028 = vmatprep.mubr.f32.mxu1 %v625_v47 }
 0x114   : > { %2029 = vmatmul.mubr.f32.gmra.mrb[34].mxu1 %v626_v51 }
 0x115   : > { %2031 = vmatprep.mubr.f32.mxu1 %v627_v50 }
 0x118   : > { %2032 = vmatmul.mubr.f32.gmra.mrb[36].mxu1 %v628_v53 }
 0x119   : > { %2034 = vmatprep.mubr.f32.mxu1 %v629_v52 }
 0x11c   : > { %2035 = vmatmul.mubr.f32.gmra.mrb[38].mxu1 %v630_v55 }
 0x11d   : > { %2037 = vmatprep.mubr.f32.mxu1 %v631_v54 }
 0x120   : > { %2038 = vmatmul.mubr.f32.gmra.mrb[40].mxu1 %v632_v57 }
 0x121   : > { %2040 = vmatprep.mubr.f32.mxu1 %v633_v56 }
 0x124   : > { %2041 = vmatmul.mubr.f32.gmra.mrb[42].mxu1 %v634_v59 }
 0x125   : > { %2043 = vmatprep.mubr.f32.mxu1 %v635_v58 }
 0x128   : > { %2044 = vmatmul.mubr.f32.gmra.mrb[44].mxu1 %v636_v61 }
 0x129   : > { %2046 = vmatprep.mubr.f32.mxu1 %v637_v60 }
 0x12c   : > { %2047 = vmatmul.mubr.f32.gmra.mrb[46].mxu1 %v638_v62 }
 0x1c3   : > { %v2003_v20 = vpop.f32.mrb[16].mxu1 }
 0x1c4   : > { %v1732_v21 = vmul.f32 -1.442695, %v2003_v20  ;;  %v721_v22 = vpop.f32.mrb[17].mxu1 }
 0x1c5   : > { %v1731_v23 = vmul.f32 -1.442695, %v721_v22 }
 0x1c6   : > { %2289 = vpow2.f32 %v1732_v21 }
 0x1c7   : > { %2291 = vpow2.f32 %v1731_v23  ;;  %v2006_v24 = vpop.f32.mrb[18].mxu1 }
 0x1c8   : > { %v1734_v25 = vmul.f32 -1.442695, %v2006_v24  ;;  %v731_v26 = vpop.f32.mrb[19].mxu1 }
 0x1c9   : > { %v1733_v27 = vmul.f32 -1.442695, %v731_v26 }
 0x1ca   : > { %2293 = vpow2.f32 %v1734_v25 }
 0x1cb   : > { %2295 = vpow2.f32 %v1733_v27  ;;  %v2009_v28 = vpop.f32.mrb[20].mxu1 }
 0x1cc   : > { %v1736_v29 = vmul.f32 -1.442695, %v2009_v28  ;;  %v741_v30 = vpop.f32.mrb[21].mxu1 }
 0x1cd   : > { %v1735_v31 = vmul.f32 -1.442695, %v741_v30 }
 0x1ce   : > { %2297 = vpow2.f32 %v1736_v29 }
 0x1cf   : > { %2299 = vpow2.f32 %v1735_v31  ;;  %v2012_v32 = vpop.f32.mrb[22].mxu1 }
 0x1d0   : > { %v2290_v33 = vpop.eup %2289  ;;  %v1738_v34 = vmul.f32 -1.442695, %v2012_v32  ;;  %v751_v35 = vpop.f32.mrb[23].mxu1 }
 0x1d1   : > { %v2292_v36 = vpop.eup %2291  ;;  %v977_v37 = vadd.f32 1.0, %v2290_v33  ;;  %v1737_v38 = vmul.f32 -1.442695, %v751_v35 }
 0x1d2   : > { %v976_v39 = vadd.f32 1.0, %v2292_v36  ;;  %2301 = vpow2.f32 %v1738_v34 }
 0x1d3   : > { %2303 = vrcp.f32 %v977_v37  ;;  %v2015_v40 = vpop.f32.mrb[24].mxu1 }
 0x1d4   : > { %v2294_v41 = vpop.eup %2293  ;;  %2305 = vrcp.f32 %v976_v39  ;;  %v1740_v42 = vmul.f32 -1.442695, %v2015_v40  ;;  %v761_v43 = vpop.f32.mrb[25].mxu1 }
 0x1d5   : > { %v2296_v44 = vpop.eup %2295  ;;  %v979_v45 = vadd.f32 1.0, %v2294_v41  ;;  %2307 = vpow2.f32 %v1737_v38  ;;  %v1739_v46 = vmul.f32 -1.442695, %v761_v43 }
 0x1d6   : > { %v978_v47 = vadd.f32 1.0, %v2296_v44  ;;  %2309 = vpow2.f32 %v1740_v42 }
 0x1d7   : > { %2311 = vrcp.f32 %v979_v45  ;;  %v2018_v48 = vpop.f32.mrb[26].mxu1 }
 0x1d8   : > { %v2298_v49 = vpop.eup %2297  ;;  %2313 = vrcp.f32 %v978_v47  ;;  %v1742_v50 = vmul.f32 -1.442695, %v2018_v48  ;;  %v771_v51 = vpop.f32.mrb[27].mxu1 }
 0x1d9   : > { %v2300_v52 = vpop.eup %2299  ;;  %v981_v53 = vadd.f32 1.0, %v2298_v49  ;;  %2315 = vpow2.f32 %v1739_v46  ;;  %v1741_v54 = vmul.f32 -1.442695, %v771_v51 }
 0x1da   : > { %v980_v55 = vadd.f32 1.0, %v2300_v52  ;;  %2317 = vpow2.f32 %v1742_v50 }
 0x1db   : > { %2319 = vrcp.f32 %v981_v53  ;;  %v2021_v56 = vpop.f32.mrb[28].mxu1 }
 0x1dc   : > { %v2302_v57 = vpop.eup %2301  ;;  %2321 = vrcp.f32 %v980_v55  ;;  %v1744_v58 = vmul.f32 -1.442695, %v2021_v56  ;;  %v781_v59 = vpop.f32.mrb[29].mxu1 }
 0x1dd   : > { %v2304_v60 = vpop.eup %2303  ;;  %v983_v61 = vadd.f32 1.0, %v2302_v57  ;;  %2323 = vpow2.f32 %v1741_v54  ;;  %v1743_v62 = vmul.f32 -1.442695, %v781_v59 }
 0x1de   : > { %v2306_v63 = vpop.eup %2305  ;;  %2325 = vpow2.f32 %v1744_v58 }
 0x1df   : > { %v2308_v0 = vpop.eup %2307  ;;  %v2024_v1 = vpop.f32.mrb[30].mxu1  ;;  %2081 = vmatprep.mubr.f32.mxu0 %v2306_v63  ;;  %2327 = vpow2.f32 %v1743_v62 }
 0x1e0   : > { %v2310_v2 = vpop.eup %2309  ;;  %v982_v3 = vadd.f32 1.0, %v2308_v0  ;;  %v1746_v4 = vmul.f32 -1.442695, %v2024_v1  ;;  %v791_v5 = vpop.f32.mrb[31].mxu1  ;;  %2082 = vmatmul.mubr.f32.vlgmr.msra.gmra.mrb[16].mxu0 %v2304_v60  ;;  %2329 = vrcp.f32 %v983_v61 }
 0x1e1   : > { %v2312_v6 = vpop.eup %2311  ;;  %v985_v7 = vadd.f32 1.0, %v2310_v2  ;;  %v1745_v8 = vmul.f32 -1.442695, %v791_v5 }
 0x1e2   : > { %v2314_v9 = vpop.eup %2313  ;;  %2331 = vrcp.f32 %v982_v3 }
 0x1e3   : > { %v2316_v10 = vpop.eup %2315  ;;  %2333 = vrcp.f32 %v985_v7  ;;  %v2027_v11 = vpop.f32.mrb[32].mxu1  ;;  %2084 = vmatprep.mubr.f32.mxu0 %v2314_v9 }
 0x1e4   : > { %v2318_v12 = vpop.eup %2317  ;;  %v984_v13 = vadd.f32 1.0, %v2316_v10  ;;  %2335 = vpow2.f32 %v1746_v4  ;;  %v1748_v14 = vmul.f32 -1.442695, %v2027_v11  ;;  %v801_v15 = vpop.f32.mrb[33].mxu1  ;;  %2085 = vmatmul.mubr.f32.gmra.mrb[18].mxu0 %v2312_v6 }
 0x1e5   : > { %v2320_v16 = vpop.eup %2319  ;;  %v987_v17 = vadd.f32 1.0, %v2318_v12  ;;  %2337 = vpow2.f32 %v1745_v8  ;;  %v1747_v18 = vmul.f32 -1.442695, %v801_v15 }
 0x1e6   : > { %v2322_v19 = vpop.eup %2321  ;;  %2339 = vrcp.f32 %v984_v13 }
 0x1e7   : > { %v2324_v20 = vpop.eup %2323  ;;  %2341 = vrcp.f32 %v987_v17  ;;  %v2030_v21 = vpop.f32.mrb[34].mxu1  ;;  %2087 = vmatprep.mubr.f32.mxu0 %v2322_v19 }
 0x1e8   : > { %v2326_v22 = vpop.eup %2325  ;;  %v986_v23 = vadd.f32 1.0, %v2324_v20  ;;  %2343 = vpow2.f32 %v1748_v14  ;;  %v1750_v24 = vmul.f32 -1.442695, %v2030_v21  ;;  %v811_v25 = vpop.f32.mrb[35].mxu1  ;;  %2088 = vmatmul.mubr.f32.gmra.mrb[20].mxu0 %v2320_v16 }
 0x1e9   : > { %v989_v26 = vadd.f32 1.0, %v2326_v22  ;;  %2345 = vpow2.f32 %v1747_v18  ;;  %v2328_v27 = vpop.eup %2327  ;;  %v1749_v28 = vmul.f32 -1.442695, %v811_v25 }
 0x1ea   : > { %2347 = vrcp.f32 %v986_v23  ;;  %v2330_v29 = vpop.eup %2329  ;;  %v988_v30 = vadd.f32 1.0, %v2328_v27 }
 0x1eb   : > { %2349 = vrcp.f32 %v989_v26  ;;  %v2033_v31 = vpop.f32.mrb[36].mxu1 }
 0x1ec   : > { %v2332_v32 = vpop.eup %2331  ;;  %2351 = vpow2.f32 %v1750_v24  ;;  %v1752_v33 = vmul.f32 -1.442695, %v2033_v31  ;;  %v821_v34 = vpop.f32.mrb[37].mxu1 }
 0x1ed   : > { %v2334_v35 = vpop.eup %2333  ;;  %2353 = vrcp.f32 %v988_v30  ;;  %2090 = vmatprep.mubr.f32.mxu0 %v2332_v32  ;;  %v1751_v36 = vmul.f32 -1.442695, %v821_v34 }
 0x1ee   : > { %v2336_v37 = vpop.eup %2335  ;;  %2355 = vpow2.f32 %v1749_v28  ;;  %2091 = vmatmul.mubr.f32.gmra.mrb[22].mxu0 %v2330_v29 }
 0x1ef   : > { %v2338_v38 = vpop.eup %2337  ;;  %v991_v39 = vadd.f32 1.0, %v2336_v37  ;;  %2357 = vpow2.f32 %v1752_v33  ;;  %v2036_v40 = vpop.f32.mrb[38].mxu1 }
 0x1f0   : > { %v2340_v41 = vpop.eup %2339  ;;  %v990_v42 = vadd.f32 1.0, %v2338_v38  ;;  %2359 = vpow2.f32 %v1751_v36  ;;  %v1754_v43 = vmul.f32 -1.442695, %v2036_v40  ;;  %v831_v44 = vpop.f32.mrb[39].mxu1 }
 0x1f1   : > { %v2342_v45 = vpop.eup %2341  ;;  %2361 = vrcp.f32 %v991_v39  ;;  %2093 = vmatprep.mubr.f32.mxu0 %v2340_v41  ;;  %v1753_v46 = vmul.f32 -1.442695, %v831_v44 }
 0x1f2   : > { %v2344_v47 = vpop.eup %2343  ;;  %2363 = vrcp.f32 %v990_v42  ;;  %2094 = vmatmul.mubr.f32.gmra.mrb[24].mxu0 %v2334_v35 }
 0x1f3   : > { %v2346_v48 = vpop.eup %2345  ;;  %v993_v49 = vadd.f32 1.0, %v2344_v47  ;;  %2365 = vpow2.f32 %v1754_v43  ;;  %v2039_v50 = vpop.f32.mrb[40].mxu1 }
 0x1f4   : > { %v2348_v51 = vpop.eup %2347  ;;  %v992_v52 = vadd.f32 1.0, %v2346_v48  ;;  %2367 = vpow2.f32 %v1753_v46  ;;  %v1756_v53 = vmul.f32 -1.442695, %v2039_v50  ;;  %v841_v54 = vpop.f32.mrb[41].mxu1 }
 0x1f5   : > { %v2350_v55 = vpop.eup %2349  ;;  %2369 = vrcp.f32 %v993_v49  ;;  %2096 = vmatprep.mubr.f32.mxu0 %v2348_v51  ;;  %v1755_v56 = vmul.f32 -1.442695, %v841_v54 }
 0x1f6   : > { %v2352_v57 = vpop.eup %2351  ;;  %2371 = vrcp.f32 %v992_v52  ;;  %2097 = vmatmul.mubr.f32.gmra.mrb[26].mxu0 %v2342_v45  ;;  %v2751_v52 = vld [vmem:[%s2962_s4] ss:$0 sm:$0xff] }
 0x1f7   : > { %v2354_v58 = vpop.eup %2353  ;;  %2373 = vpow2.f32 %v1756_v53  ;;  %v2042_v59 = vpop.f32.mrb[42].mxu1  ;;  %v995_v61 = vadd.f32 1.0, %v2352_v57 }
 0x1f8   : > { %v2356_v60 = vpop.eup %2355  ;;  %2375 = vpow2.f32 %v1755_v56  ;;  %v1758_v62 = vmul.f32 -1.442695, %v2042_v59  ;;  %2099 = vmatprep.mubr.f32.mxu0 %v2354_v58  ;;  %v851_v63 = vpop.f32.mrb[43].mxu1 }
 0x1f9   : > { %v2358_v0 = vpop.eup %2357  ;;  %v994_v1 = vadd.f32 1.0, %v2356_v60  ;;  %v1757_v3 = vmul.f32 -1.442695, %v851_v63 }
 0x1fa   : > { %v2360_v2 = vpop.eup %2359  ;;  %2377 = vpow2.f32 %v1758_v62  ;;  %2100 = vmatmul.mubr.f32.gmra.mrb[28].mxu0 %v2350_v55  ;;  %v997_v8 = vadd.f32 1.0, %v2358_v0 }
 0x1fb   : > { %v2362_v4 = vpop.eup %2361  ;;  %2379 = vrcp.f32 %v994_v1  ;;  %v996_v5 = vadd.f32 1.0, %v2360_v2  ;;  %v2045_v6 = vpop.f32.mrb[44].mxu1 }
 0x1fc   : > { %v2364_v7 = vpop.eup %2363  ;;  %2381 = vrcp.f32 %v995_v61  ;;  %v1760_v9 = vmul.f32 -1.442695, %v2045_v6  ;;  %v861_v10 = vpop.f32.mrb[45].mxu1 }
 0x1fd   : > { %v2366_v11 = vpop.eup %2365  ;;  %2383 = vrcp.f32 %v996_v5  ;;  %2102 = vmatprep.mubr.f32.mxu0 %v2364_v7  ;;  %v1759_v13 = vmul.f32 -1.442695, %v861_v10 }
 0x1fe   : > { %v2368_v12 = vpop.eup %2367  ;;  %2385 = vpow2.f32 %v1757_v3  ;;  %2103 = vmatmul.mubr.f32.gmra.mrb[30].mxu0 %v2362_v4  ;;  %v999_v18 = vadd.f32 1.0, %v2366_v11 }
 0x1ff   : > { %v2370_v14 = vpop.eup %2369  ;;  %v998_v15 = vadd.f32 1.0, %v2368_v12  ;;  %2387 = vpow2.f32 %v1760_v9  ;;  %v2048_v16 = vpop.f32.mrb[46].mxu1 }
 0x200   : > { %v2372_v17 = vpop.eup %2371  ;;  %2389 = vrcp.f32 %v997_v8  ;;  %v1762_v19 = vmul.f32 -1.442695, %v2048_v16  ;;  %v871_v20 = vpop.f32.mrb[47].mxu1 }
 0x201   : > { %v2374_v21 = vpop.eup %2373  ;;  %2391 = vrcp.f32 %v998_v15  ;;  %2105 = vmatprep.mubr.f32.mxu0 %v2372_v17  ;;  %v1761_v23 = vmul.f32 -1.442695, %v871_v20 }
 0x202   : > { %v2376_v22 = vpop.eup %2375  ;;  %2393 = vpow2.f32 %v1759_v13  ;;  %2106 = vmatmul.mubr.f32.gmra.mrb[32].mxu0 %v2370_v14  ;;  %v1001_v26 = vadd.f32 1.0, %v2374_v21 }
 0x203   : > { %v1000_v24 = vadd.f32 1.0, %v2376_v22  ;;  %2395 = vpow2.f32 %v1762_v19 }
 0x204   : > { %v2378_v25 = vpop.eup %2377  ;;  %2397 = vrcp.f32 %v999_v18 }
 0x205   : > { %v2380_v27 = vpop.eup %2379  ;;  %2399 = vrcp.f32 %v1000_v24  ;;  %v1003_v31 = vadd.f32 1.0, %v2378_v25 }
 0x206   : > { %v2382_v28 = vpop.eup %2381  ;;  %2401 = vpow2.f32 %v1761_v23  ;;  %2108 = vmatprep.mubr.f32.mxu0 %v2380_v27 }
 0x207   : > { %v2384_v29 = vpop.eup %2383  ;;  %2109 = vmatmul.mubr.f32.gmra.mrb[34].mxu0 %v2382_v28  ;;  %2403 = vrcp.f32 %v1001_v26 }
 0x208   : > { %v2386_v30 = vpop.eup %2385  ;;  %2111 = vmatprep.mubr.f32.mxu0 %v2384_v29 }
 0x209   : > { %v2388_v32 = vpop.eup %2387  ;;  %v1002_v33 = vadd.f32 1.0, %v2386_v30 }
 0x20a   : > { %v2390_v34 = vpop.eup %2389  ;;  %v1005_v37 = vadd.f32 1.0, %v2388_v32 }
 0x20b   : > { %v2392_v35 = vpop.eup %2391  ;;  %2405 = vrcp.f32 %v1002_v33  ;;  %2112 = vmatmul.mubr.f32.gmra.mrb[36].mxu0 %v2390_v34 }
 0x20c   : > { %v2394_v36 = vpop.eup %2393  ;;  %2407 = vrcp.f32 %v1003_v31  ;;  %2114 = vmatprep.mubr.f32.mxu0 %v2392_v35 }
 0x20d   : > { %v2396_v38 = vpop.eup %2395  ;;  %v1004_v39 = vadd.f32 1.0, %v2394_v36 }
 0x20e   : > { %v2398_v40 = vpop.eup %2397  ;;  %v1007_v43 = vadd.f32 1.0, %v2396_v38 }
 0x20f   : > { %v2400_v41 = vpop.eup %2399  ;;  %2409 = vrcp.f32 %v1004_v39  ;;  %2115 = vmatmul.mubr.f32.gmra.mrb[38].mxu0 %v2398_v40 }
 0x210   : > { %v2402_v42 = vpop.eup %2401  ;;  %2411 = vrcp.f32 %v1005_v37  ;;  %2117 = vmatprep.mubr.f32.mxu0 %v2400_v41 }
 0x211   : > { %v1006_v44 = vadd.f32 1.0, %v2402_v42  ;;  %v2404_v45 = vpop.eup %2403 }
 0x213   : > { %2413 = vrcp.f32 %v1006_v44  ;;  %2118 = vmatmul.mubr.f32.gmra.mrb[40].mxu0 %v2404_v45 }
 0x214   : > { %2415 = vrcp.f32 %v1007_v43 }
 0x215   : > { %v2406_v46 = vpop.eup %2405 }
 0x216   : > { %v2408_v47 = vpop.eup %2407  ;;  %2120 = vmatprep.mubr.f32.mxu0 %v2406_v46 }
 0x217   : > { %2121 = vmatmul.mubr.f32.gmra.mrb[42].mxu0 %v2408_v47 }
 0x219   : > { %v2410_v48 = vpop.eup %2409 }
 0x21a   : > { %v2412_v49 = vpop.eup %2411  ;;  %2123 = vmatprep.mubr.f32.mxu0 %v2410_v48 }
 0x21b   : > { %2124 = vmatmul.mubr.f32.gmra.mrb[44].mxu0 %v2412_v49 }
 0x21d   : > { %v2414_v50 = vpop.eup %2413 }
 0x21e   : > { %v2416_v51 = vpop.eup %2415  ;;  %2126 = vmatprep.mubr.f32.mxu0 %v2414_v50 }
 0x21f   : > { %2127 = vmatmul.mubr.f32.gmra.mrb[46].mxu0 %v2416_v51 }
 0x2b3   : > { %v2083_v53 = vpop.f32.mrb[16].mxu0 }
 0x2b4   : > { %v1167_v54 = vadd.f32 %v2083_v53, %v2751_v52  ;;  %v1161_v55 = vpop.f32.mrb[17].mxu0 }
 0x2b5   : > { %v1162_v56 = vadd.f32 %v2751_v52, %v1161_v55 }
 0x2b6   : > { %1321 = vst [vmem:[%s2755_s11 + $0x8] sm:$0xff] %v1167_v54 }
 0x2b7   : > { %1320 = vst [vmem:[%s2755_s11] sm:$0xff] %v1162_v56  ;;  %v2086_v57 = vpop.f32.mrb[18].mxu0 }
 0x2b8   : > { %v1177_v58 = vadd.f32 %v2086_v57, %v2751_v52  ;;  %v1171_v59 = vpop.f32.mrb[19].mxu0 }
 0x2b9   : > { %v1172_v60 = vadd.f32 %v2751_v52, %v1171_v59 }
 0x2ba   : > { %1323 = vst [vmem:[%s2755_s11 + $0x18] sm:$0xff] %v1177_v58 }
 0x2bb   : > { %1322 = vst [vmem:[%s2755_s11 + $0x10] sm:$0xff] %v1172_v60  ;;  %v2089_v61 = vpop.f32.mrb[20].mxu0 }
 0x2bc   : > { %v1187_v62 = vadd.f32 %v2089_v61, %v2751_v52  ;;  %v1181_v63 = vpop.f32.mrb[21].mxu0 }
 0x2bd   : > { %v1182_v0 = vadd.f32 %v2751_v52, %v1181_v63 }
 0x2be   : > { %1325 = vst [vmem:[%s2755_s11 + $0x28] sm:$0xff] %v1187_v62 }
 0x2bf   : > { %1324 = vst [vmem:[%s2755_s11 + $0x20] sm:$0xff] %v1182_v0 }
 0x2c1   : > { %v2092_v1 = vpop.f32.mrb[22].mxu0 }
 0x2c2   : > { %v1197_v2 = vadd.f32 %v2092_v1, %v2751_v52  ;;  %v1191_v3 = vpop.f32.mrb[23].mxu0 }
 0x2c3   : > { %v1192_v4 = vadd.f32 %v2751_v52, %v1191_v3 }
 0x2c4   : > { %1327 = vst [vmem:[%s2755_s11 + $0x38] sm:$0xff] %v1197_v2 }
 0x2c5   : > { %1326 = vst [vmem:[%s2755_s11 + $0x30] sm:$0xff] %v1192_v4  ;;  %v2095_v5 = vpop.f32.mrb[24].mxu0 }
 0x2c6   : > { %v1207_v6 = vadd.f32 %v2095_v5, %v2751_v52  ;;  %v1201_v7 = vpop.f32.mrb[25].mxu0 }
 0x2c7   : > { %v1202_v8 = vadd.f32 %v2751_v52, %v1201_v7 }
 0x2c8   : > { %1329 = vst [vmem:[%s2755_s11 + $0x48] sm:$0xff] %v1207_v6 }
 0x2c9   : > { %1328 = vst [vmem:[%s2755_s11 + $0x40] sm:$0xff] %v1202_v8  ;;  %v2098_v9 = vpop.f32.mrb[26].mxu0 }
 0x2ca   : > { %v1217_v10 = vadd.f32 %v2098_v9, %v2751_v52  ;;  %v1211_v11 = vpop.f32.mrb[27].mxu0 }
 0x2cb   : > { %v1212_v12 = vadd.f32 %v2751_v52, %v1211_v11 }
 0x2cc   : > { %1331 = vst [vmem:[%s2755_s11 + $0x58] sm:$0xff] %v1217_v10 }
 0x2cd   : > { %1330 = vst [vmem:[%s2755_s11 + $0x50] sm:$0xff] %v1212_v12  ;;  %v2101_v13 = vpop.f32.mrb[28].mxu0 }
 0x2ce   : > { %v1227_v14 = vadd.f32 %v2101_v13, %v2751_v52  ;;  %v1221_v15 = vpop.f32.mrb[29].mxu0 }
 0x2cf   : > { %v1222_v16 = vadd.f32 %v2751_v52, %v1221_v15 }
 0x2d0   : > { %1333 = vst [vmem:[%s2755_s11 + $0x68] sm:$0xff] %v1227_v14 }
 0x2d1   : > { %1332 = vst [vmem:[%s2755_s11 + $0x60] sm:$0xff] %v1222_v16  ;;  %v2104_v17 = vpop.f32.mrb[30].mxu0 }
 0x2d2   : > { %v1237_v18 = vadd.f32 %v2104_v17, %v2751_v52  ;;  %v1231_v19 = vpop.f32.mrb[31].mxu0 }
 0x2d3   : > { %v1232_v20 = vadd.f32 %v2751_v52, %v1231_v19 }
 0x2d4   : > { %1335 = vst [vmem:[%s2755_s11 + $0x78] sm:$0xff] %v1237_v18 }
 0x2d5   : > { %1334 = vst [vmem:[%s2755_s11 + $0x70] sm:$0xff] %v1232_v20  ;;  %v2107_v21 = vpop.f32.mrb[32].mxu0 }
 0x2d6   : > { %v1247_v22 = vadd.f32 %v2107_v21, %v2751_v52  ;;  %v1241_v23 = vpop.f32.mrb[33].mxu0 }
 0x2d7   : > { %v1242_v24 = vadd.f32 %v2751_v52, %v1241_v23 }
 0x2d8   : > { %1337 = vst [vmem:[%s2755_s11 + $0x88] sm:$0xff] %v1247_v22 }
 0x2d9   : > { %1336 = vst [vmem:[%s2755_s11 + $0x80] sm:$0xff] %v1242_v24 }
 0x2da   : > { %v2110_v25 = vpop.f32.mrb[34].mxu0 }
 0x2db   : > { %v1257_v26 = vadd.f32 %v2110_v25, %v2751_v52  ;;  %v1251_v27 = vpop.f32.mrb[35].mxu0 }
 0x2dc   : > { %v1252_v28 = vadd.f32 %v2751_v52, %v1251_v27 }
 0x2dd   : > { %1339 = vst [vmem:[%s2755_s11 + $0x98] sm:$0xff] %v1257_v26 }
 0x2de   : > { %1338 = vst [vmem:[%s2755_s11 + $0x90] sm:$0xff] %v1252_v28  ;;  %v2113_v29 = vpop.f32.mrb[36].mxu0 }
 0x2df   : > { %v1267_v30 = vadd.f32 %v2113_v29, %v2751_v52  ;;  %v1261_v31 = vpop.f32.mrb[37].mxu0 }
 0x2e0   : > { %v1262_v32 = vadd.f32 %v2751_v52, %v1261_v31 }
 0x2e1   : > { %1341 = vst [vmem:[%s2755_s11 + $0xa8] sm:$0xff] %v1267_v30 }
 0x2e2   : > { %1340 = vst [vmem:[%s2755_s11 + $0xa0] sm:$0xff] %v1262_v32  ;;  %v2116_v33 = vpop.f32.mrb[38].mxu0 }
 0x2e3   : > { %v1277_v34 = vadd.f32 %v2116_v33, %v2751_v52  ;;  %v1271_v35 = vpop.f32.mrb[39].mxu0 }
 0x2e4   : > { %v1272_v36 = vadd.f32 %v2751_v52, %v1271_v35 }
 0x2e5   : > { %1343 = vst [vmem:[%s2755_s11 + $0xb8] sm:$0xff] %v1277_v34 }
 0x2e6   : > { %1342 = vst [vmem:[%s2755_s11 + $0xb0] sm:$0xff] %v1272_v36  ;;  %v2119_v37 = vpop.f32.mrb[40].mxu0 }
 0x2e7   : > { %v1287_v38 = vadd.f32 %v2119_v37, %v2751_v52  ;;  %v1281_v39 = vpop.f32.mrb[41].mxu0 }
 0x2e8   : > { %v1282_v40 = vadd.f32 %v2751_v52, %v1281_v39 }
 0x2e9   : > { %1345 = vst [vmem:[%s2755_s11 + $0xc8] sm:$0xff] %v1287_v38 }
 0x2ea   : > { %1344 = vst [vmem:[%s2755_s11 + $0xc0] sm:$0xff] %v1282_v40  ;;  %v2122_v41 = vpop.f32.mrb[42].mxu0 }
 0x2eb   : > { %v1297_v42 = vadd.f32 %v2122_v41, %v2751_v52  ;;  %v1291_v43 = vpop.f32.mrb[43].mxu0 }
 0x2ec   : > { %v1292_v44 = vadd.f32 %v2751_v52, %v1291_v43 }
 0x2ed   : > { %1347 = vst [vmem:[%s2755_s11 + $0xd8] sm:$0xff] %v1297_v42 }
 0x2ee   : > { %1346 = vst [vmem:[%s2755_s11 + $0xd0] sm:$0xff] %v1292_v44  ;;  %v2125_v45 = vpop.f32.mrb[44].mxu0 }
 0x2ef   : > { %v1307_v46 = vadd.f32 %v2125_v45, %v2751_v52  ;;  %v1301_v47 = vpop.f32.mrb[45].mxu0 }
 0x2f0   : > { %v1302_v48 = vadd.f32 %v2751_v52, %v1301_v47  ;;  %1358 = sbr.rel (!%p2560_p4) target bundleno = 815 (0x32f), region = 44 }
 0x2f1   : > { %1349 = vst [vmem:[%s2755_s11 + $0xe8] sm:$0xff] %v1307_v46 }
 0x2f2   : > { %1348 = vst [vmem:[%s2755_s11 + $0xe0] sm:$0xff] %v1302_v48  ;;  %v2128_v49 = vpop.f32.mrb[46].mxu0 }
 0x2f3   : > { %v1317_v50 = vadd.f32 %v2128_v49, %v2751_v52  ;;  %v1311_v51 = vpop.f32.mrb[47].mxu0 }
 0x2f4   : > { %v1312_v53 = vadd.f32 %v2751_v52, %v1311_v51 }
 0x2f5   : > { %1351 = vst [vmem:[%s2755_s11 + $0xf8] sm:$0xff] %v1317_v50 }
 0x2f6   : > { %1350 = vst [vmem:[%s2755_s11 + $0xf0] sm:$0xff] %v1312_v53 }
 0x2f7   : > { %s2974_s18 = smov (!%p1361_p8, %s1360_s18), 32 }
 0x2f8   : > { %s1766_s15 = sshll.u32 %s2974_s18, 7 }
 0x2f9   : > { %p1769_p9 = scmp.eq.s32.totalorder %s1766_s15, 0 }
 0x2fa   : > { %s2832_s16 = sshrl.u32 (!%p1769_p9), %s2974_s18, 5 }
 0x2fb   : > { %1369 = sbr.rel (%p1769_p9) target bundleno = 815 (0x32f), region = 48  ;;  %p1770_p10 = scmp.le.s32.totalorder (!%p1769_p9), %s2832_s16, 0 }
 0x302   : > { %1647 = sbr.rel (%p1770_p10) target bundleno = 794 (0x31a), region = 124  ;;  %s2965_s21 = smov (!%p1770_p10), %s2826_s14 }
 0x303   : > { %s2966_s26 = smov (!%p1770_p10), %s2755_s11  ;;  %s2841_s6 = smov (!%p1770_p10), 0  }
 0x304   : > { %s2843_s20 = smov (!%p1770_p10), 0  }
 0x309 LB: >> { %v1493_v52 = vld [vmem:[%s2479_s26] sm:$0xff]  ;;  %v1495_v54 = vld [vmem:[%s2479_s26 + $0x8] sm:$0xff]  ;;  %v1497_v55 = vld [vmem:[%s2479_s26 + $0x10] sm:$0xff]  ;;  %s1557_s23 = sadd.s32 1, %s2483_s6  ;;  %s1487_s20 = sadd.s32 1, %s2487_s20   ;;  %s2487_s20 = sphi %s2843_s20, %s1487_s20   ;;  %s2483_s6 = sphi %s2841_s6, %s2969_s6   ;;  %s2479_s26 = sphi %s2966_s26, %s2968_s26   ;;  %s2475_s21 = sphi %s2965_s21, %s2967_s21  }
 0x30a   : >> { %1494 = vst [vmem:[%s2475_s21] sm:$0xff] %v1493_v52  ;;  %1496 = vst [vmem:[%s2475_s21 + $0x8] sm:$0xff] %v1495_v54  ;;  %v1499_v56 = vld [vmem:[%s2479_s26 + $0x18] sm:$0xff]  ;;  %v1501_v57 = vld [vmem:[%s2479_s26 + $0x20] sm:$0xff]  ;;  %p1558_p11 = scmp.ge.s32.totalorder %s1557_s23, %s2832_s16  ;;  %p1486_p12 = scmp.ge.s32.totalorder %s1487_s20, %s2832_s16 }
 0x30b   : >> { %1498 = vst [vmem:[%s2475_s21 + $0x10] sm:$0xff] %v1497_v55  ;;  %v1503_v58 = vld [vmem:[%s2479_s26 + $0x28] sm:$0xff]  ;;  %1500 = vst [vmem:[%s2475_s21 + $0x18] sm:$0xff] %v1499_v56  ;;  %v1505_v59 = vld [vmem:[%s2479_s26 + $0x30] sm:$0xff] }
 0x30c   : >> { %1502 = vst [vmem:[%s2475_s21 + $0x20] sm:$0xff] %v1501_v57  ;;  %1504 = vst [vmem:[%s2475_s21 + $0x28] sm:$0xff] %v1503_v58  ;;  %v1507_v60 = vld [vmem:[%s2479_s26 + $0x38] sm:$0xff]  ;;  %v1509_v61 = vld [vmem:[%s2479_s26 + $0x40] sm:$0xff]  ;;  %s2976_s23 = smov (%p1558_p11, %s1557_s23), 0 }
 0x30d   : >> { %1506 = vst [vmem:[%s2475_s21 + $0x30] sm:$0xff] %v1505_v59  ;;  %1508 = vst [vmem:[%s2475_s21 + $0x38] sm:$0xff] %v1507_v60  ;;  %v1511_v62 = vld [vmem:[%s2479_s26 + $0x48] sm:$0xff]  ;;  %v1513_v63 = vld [vmem:[%s2479_s26 + $0x50] sm:$0xff]  ;;  %s1771_s24 = sshll.u32 %s2976_s23, 8  ;;  %s2969_s6 = smov %s2976_s23 }
 0x30e   : >> { %1510 = vst [vmem:[%s2475_s21 + $0x40] sm:$0xff] %v1509_v61  ;;  %v1515_v0 = vld [vmem:[%s2479_s26 + $0x58] sm:$0xff]  ;;  %1512 = vst [vmem:[%s2475_s21 + $0x48] sm:$0xff] %v1511_v62  ;;  %v1517_v1 = vld [vmem:[%s2479_s26 + $0x60] sm:$0xff]  ;;  %s2899_s27 = scalar_lea.vmem %s2755_s11, %s1771_s24 [#allocation2]   ;;  %s1563_s28 = scalar_lea.vmem %s2826_s14, %s1771_s24  }
 0x30f   : >> { %1514 = vst [vmem:[%s2475_s21 + $0x50] sm:$0xff] %v1513_v63  ;;  %1516 = vst [vmem:[%s2475_s21 + $0x58] sm:$0xff] %v1515_v0  ;;  %v1519_v2 = vld [vmem:[%s2479_s26 + $0x68] sm:$0xff]  ;;  %v1521_v3 = vld [vmem:[%s2479_s26 + $0x70] sm:$0xff] }
 0x310   : >> { %1518 = vst [vmem:[%s2475_s21 + $0x60] sm:$0xff] %v1517_v1  ;;  %1520 = vst [vmem:[%s2475_s21 + $0x68] sm:$0xff] %v1519_v2  ;;  %v1523_v4 = vld [vmem:[%s2479_s26 + $0x78] sm:$0xff]  ;;  %v1525_v5 = vld [vmem:[%s2479_s26 + $0x80] sm:$0xff] }
 0x311   : >> { %1522 = vst [vmem:[%s2475_s21 + $0x70] sm:$0xff] %v1521_v3  ;;  %v1527_v6 = vld [vmem:[%s2479_s26 + $0x88] sm:$0xff]  ;;  %1524 = vst [vmem:[%s2475_s21 + $0x78] sm:$0xff] %v1523_v4  ;;  %v1529_v7 = vld [vmem:[%s2479_s26 + $0x90] sm:$0xff] }
 0x312   : >> { %1526 = vst [vmem:[%s2475_s21 + $0x80] sm:$0xff] %v1525_v5  ;;  %1528 = vst [vmem:[%s2475_s21 + $0x88] sm:$0xff] %v1527_v6  ;;  %v1531_v8 = vld [vmem:[%s2479_s26 + $0x98] sm:$0xff]  ;;  %v1533_v9 = vld [vmem:[%s2479_s26 + $0xa0] sm:$0xff] }
 0x313   : >> { %1530 = vst [vmem:[%s2475_s21 + $0x90] sm:$0xff] %v1529_v7  ;;  %1532 = vst [vmem:[%s2475_s21 + $0x98] sm:$0xff] %v1531_v8  ;;  %v1535_v10 = vld [vmem:[%s2479_s26 + $0xa8] sm:$0xff]  ;;  %v1537_v11 = vld [vmem:[%s2479_s26 + $0xb0] sm:$0xff]  ;;  %1489 = sbr.rel (!%p1486_p12) target bundleno = 777 (0x309), region = 130 }
 0x314   : >> { %1534 = vst [vmem:[%s2475_s21 + $0xa0] sm:$0xff] %v1533_v9  ;;  %v1539_v12 = vld [vmem:[%s2479_s26 + $0xb8] sm:$0xff]  ;;  %1536 = vst [vmem:[%s2475_s21 + $0xa8] sm:$0xff] %v1535_v10  ;;  %v1541_v13 = vld [vmem:[%s2479_s26 + $0xc0] sm:$0xff] }
 0x315   : >> { %1538 = vst [vmem:[%s2475_s21 + $0xb0] sm:$0xff] %v1537_v11  ;;  %1540 = vst [vmem:[%s2475_s21 + $0xb8] sm:$0xff] %v1539_v12  ;;  %v1543_v14 = vld [vmem:[%s2479_s26 + $0xc8] sm:$0xff]  ;;  %v1545_v15 = vld [vmem:[%s2479_s26 + $0xd0] sm:$0xff] }
 0x316   : >> { %1542 = vst [vmem:[%s2475_s21 + $0xc0] sm:$0xff] %v1541_v13  ;;  %1544 = vst [vmem:[%s2475_s21 + $0xc8] sm:$0xff] %v1543_v14  ;;  %v1547_v16 = vld [vmem:[%s2479_s26 + $0xd8] sm:$0xff]  ;;  %v1549_v17 = vld [vmem:[%s2479_s26 + $0xe0] sm:$0xff] }
 0x317   : >> { %1546 = vst [vmem:[%s2475_s21 + $0xd0] sm:$0xff] %v1545_v15  ;;  %v1551_v18 = vld [vmem:[%s2479_s26 + $0xe8] sm:$0xff]  ;;  %1548 = vst [vmem:[%s2475_s21 + $0xd8] sm:$0xff] %v1547_v16  ;;  %v1553_v19 = vld [vmem:[%s2479_s26 + $0xf0] sm:$0xff] }
 0x318   : >> { %1550 = vst [vmem:[%s2475_s21 + $0xe0] sm:$0xff] %v1549_v17  ;;  %1552 = vst [vmem:[%s2475_s21 + $0xe8] sm:$0xff] %v1551_v18  ;;  %v1555_v20 = vld [vmem:[%s2479_s26 + $0xf8] sm:$0xff]  ;;  %s2968_s26 = smov %s2899_s27 }
 0x319   : >> { %1554 = vst [vmem:[%s2475_s21 + $0xf0] sm:$0xff] %v1553_v19  ;;  %1556 = vst [vmem:[%s2475_s21 + $0xf8] sm:$0xff] %v1555_v20  ;;  %s2967_s21 = smov %s1563_s28 }
 0x31a PF: > { %s2940_s29 = sand.u32 31, %s2974_s18   ;;  %s1782_s30 = sshll.u32 %s2832_s16, 8 }
 0x31b   : > { %s1568_s7 = scalar_lea.vmem %s2755_s11, %s1782_s30 [#allocation2]   ;;  %s1570_s8 = scalar_lea.vmem %s2826_s14, %s1782_s30  }
 0x31c   : > { %p1776_p13 = scmp.le.s32.totalorder %s2940_s29, 0 }
 0x31d   : > { %s2489_s9 = smov (!%p1776_p13), %s1570_s8   ;;  %s2493_s10 = smov (!%p1776_p13), %s1568_s7  }
 0x31e   : > { %1661 = sbr.rel (%p1776_p13) target bundleno = 815 (0x32f), region = 135  ;;  %s2497_s12 = smov (!%p1776_p13), 0  }
 0x31f   : > { %s2501_s13 = smov (!%p1776_p13), 0  }
 0x325 LB: >> { %v1580_v21 = vld [vmem:[%s2495_s10] sm:$0xff]  ;;  %s1582_s18 = sadd.s32 1, %s2499_s12  ;;  %s1574_s13 = sadd.s32 1, %s2503_s13   ;;  %s2503_s13 = sphi %s2501_s13, %s1574_s13   ;;  %s2499_s12 = sphi %s2497_s12, %s2498_s12   ;;  %s2495_s10 = sphi %s2493_s10, %s1587_s10   ;;  %s2491_s9 = sphi %s2489_s9, %s1588_s9  }
 0x326   : >> { %1581 = vst [vmem:[%s2491_s9] sm:$0xff] %v1580_v21  ;;  %p1583_p0 = scmp.ge.s32.totalorder %s1582_s18, %s2940_s29  ;;  %p1573_p1 = scmp.ge.s32.totalorder %s1574_s13, %s2940_s29 }
 0x328   : >> { %s2978_s18 = smov (%p1583_p0, %s1582_s18), 0  ;;  %1576 = sbr.rel (!%p1573_p1) target bundleno = 805 (0x325), region = 141 }
 0x329   : >> { %s1777_s11 = sshll.u32 %s2978_s18, 3  ;;  %s2498_s12 = smov %s2978_s18  }
 0x32a   : >> { %s1587_s10 = scalar_lea.vmem %s1568_s7, %s1777_s11 [#allocation2]   ;;  %s1588_s9 = scalar_lea.vmem %s1570_s8, %s1777_s11  }
 0x32f PF: > { %p12_p2 = scmp.ge.s32.totalorder %s2550_s22, 4   ;;  %s2970_s18 = smov %s2467_s19 }
 0x330   : > { %s2971_s19 = smov %s2558_s25  ;;  %s2972_s20 = smov %s2550_s22 }
 0x331   :  { %14 = sbr.rel (!%p12_p2) target bundleno = 2 (0x2), region = 152 }

</bundles_post_ra>
